<compile_context>
chip_gen: v7x
topology: tpu7x:2x2x1
jax: 0.10.0
libtpu: 0.0.40
codegen_flags: <defaults>
</compile_context>

<pallas_src>
import functools

import jax
import jax.numpy as jnp
from jax.experimental import pallas as pl
from jax.experimental.pallas import tpu as pltpu


def _round_up(x: int, m: int) -> int:
    return ((x + m - 1) // m) * m


def _nbytes(shape, dt) -> int:
    n = 1
    for s in shape:
        n *= int(s)
    return n * jnp.dtype(dt).itemsize


def _clf_head_kernel(x_ref, wd_ref, bd_ref, wo_ref, bo_ref, out_ref):
    # x:  [TM, Hp] bf16   wd: [Hp, Hp] bf16   bd: [1, Hp] f32
    # wo: [Hp, Lp] bf16   bo: [1, Lp]  f32    out: [TM, Lp]
    # dropout == identity in eval mode.

    # dense: bf16 operands straight to the MXU, f32 accumulation.
    h = jnp.dot(x_ref[...], wd_ref[...], preferred_element_type=jnp.float32)
    # bias-add + tanh in f32 (correct on all generations; VPU + EUP slots),
    # single cast back to bf16 feeds the second matmul.
    h = jnp.tanh(h + bd_ref[...])

    # out_proj
    y = jnp.dot(h.astype(wo_ref.dtype), wo_ref[...],
                preferred_element_type=jnp.float32)
    y = y + bo_ref[...]

    out_ref[...] = y.astype(out_ref.dtype)


@functools.partial(jax.jit, static_argnames=("block_rows",))
def wav2vec2_classification_head(features, w_dense, b_dense, w_out, b_out,
                                 *, block_rows: int = 1024):
    """features: [B, H]; returns logits [B, num_labels]."""
    B, H = features.shape
    L = w_out.shape[1]
    out_dtype = features.dtype
    mxu_dtype = jnp.bfloat16

    # Tile-friendly padded feature sizes (only where actually needed).
    Hp = _round_up(max(H, 128), 128)          # hidden -> lane-dense multiple of 128
    Lp = _round_up(max(L, 128), 128)          # lane-dense output (unmasked stores)

    # Rows per grid step. Multiple of 8 (or == B when B < 8), and capped so the
    # batch grid has >= 2 steps when possible so both v7x TensorCores get work.
    if B <= 8:
        TM = B
    else:
        TM = min(block_rows, max(8, _round_up(pl.cdiv(B, 2), 8)))
    grid = (pl.cdiv(B, TM),)

    # --- Operand prep (bf16 MXU stream; zero pads keep the math exact:
    #     padded hidden cols give tanh(0 + 0) = 0 and padded w_out rows are 0).
    x = features.astype(mxu_dtype)
    wd = w_dense.astype(mxu_dtype)
    wo = w_out.astype(mxu_dtype)
    bd = b_dense.astype(jnp.float32).reshape(1, H)
    bo = b_out.astype(jnp.float32).reshape(1, L)
    if Hp != H:
        x = jnp.pad(x, ((0, 0), (0, Hp - H)))
        wd = jnp.pad(wd, ((0, Hp - H), (0, Hp - H)))
        wo = jnp.pad(wo, ((0, Hp - H), (0, 0)))
        bd = jnp.pad(bd, ((0, 0), (0, Hp - H)))
    if Lp != L:
        wo = jnp.pad(wo, ((0, 0), (0, Lp - L)))
        bo = jnp.pad(bo, ((0, 0), (0, Lp - L)))

    # --- VMEM budget: x/out tiles double-buffered, resident weights single-buffered.
    vmem_needed = (
        2 * _nbytes((TM, Hp), mxu_dtype)        # x tile (pipelined)
        + 2 * _nbytes((TM, Lp), out_dtype)      # out tile (pipelined)
        + _nbytes((Hp, Hp), mxu_dtype)          # dense weight (resident, 1 buffer)
        + _nbytes((1, Hp), jnp.float32)         # dense bias
        + _nbytes((Hp, Lp), mxu_dtype)          # out_proj weight
        + _nbytes((1, Lp), jnp.float32)         # out_proj bias
    )
    try:
        vmem_cap = int(pltpu.get_tpu_info().vmem_capacity_bytes)
    except Exception:
        vmem_cap = 64 << 20                     # v7x per-TC capacity (most restrictive)
    vmem_limit = max(min(int(1.5 * vmem_needed) + (2 << 20),
                         int(0.75 * vmem_cap)),
                     8 << 20)

    cost = pl.CostEstimate(
        flops=2 * B * Hp * (Hp + Lp),
        transcendentals=B * Hp,
        bytes_accessed=(_nbytes((B, Hp), mxu_dtype)
                        + _nbytes((Hp, Hp), mxu_dtype)
                        + _nbytes((Hp, Lp), mxu_dtype)
                        + _nbytes((B, Lp), out_dtype)),
    )

    resident = dict(pipeline_mode=pl.Buffered(1))

    out_padded = pl.pallas_call(
        _clf_head_kernel,
        out_shape=jax.ShapeDtypeStruct((B, Lp), out_dtype),
        grid=grid,
        in_specs=[
            pl.BlockSpec((TM, Hp), lambda i: (i, 0)),               # activations: tiled over batch
            pl.BlockSpec((Hp, Hp), lambda i: (0, 0), **resident),   # dense weight: resident
            pl.BlockSpec((1, Hp), lambda i: (0, 0), **resident),    # dense bias:   resident
            pl.BlockSpec((Hp, Lp), lambda i: (0, 0), **resident),   # out_proj weight: resident
            pl.BlockSpec((1, Lp), lambda i: (0, 0), **resident),    # out_proj bias:   resident
        ],
        out_specs=pl.BlockSpec((TM, Lp), lambda i: (i, 0)),
        compiler_params=pltpu.CompilerParams(
            dimension_semantics=("parallel",),
            vmem_limit_bytes=vmem_limit,
        ),
        cost_estimate=cost,
    )(x, wd, bd, wo, bo)

    return out_padded[:, :L]


if __name__ == "__main__":
    # Small synthetic config consistent with the module:
    #   hidden_size = 32, num_labels = 4 (['NOR', 'EGY', 'GLF', 'LEV']), batch = 2
    # (At this toy size a Pallas kernel is pure overhead vs XLA fusion; the tiling /
    #  padding here is aimed at production H=768/1024 and large batches.)
    B, H, L = 2, 32, 4

    key = jax.random.PRNGKey(0)
    k_x, k_wd, k_bd, k_wo, k_bo = jax.random.split(key, 5)

    # Deterministic parameter init (PyTorch-Linear-like uniform bounds).
    bound_d = 1.0 / (H ** 0.5)
    features = jax.random.normal(k_x, (B, H), dtype=jnp.float32)
    w_dense = jax.random.uniform(k_wd, (H, H), jnp.float32, -bound_d, bound_d)
    b_dense = jax.random.uniform(k_bd, (H,), jnp.float32, -bound_d, bound_d)
    w_out = jax.random.uniform(k_wo, (H, L), jnp.float32, -bound_d, bound_d)
    b_out = jax.random.uniform(k_bo, (L,), jnp.float32, -bound_d, bound_d)

    logits = wav2vec2_classification_head(features, w_dense, b_dense, w_out, b_out)
    logits = jax.block_until_ready(logits)

    # Reference check in plain JAX (f32); kernel uses bf16 MXU operands with f32
    # accumulation, so compare with a loosened tolerance.
    ref = jnp.tanh(features @ w_dense + b_dense) @ w_out + b_out
    assert logits.shape == (B, L)
    assert jnp.allclose(logits, ref, atol=2e-2, rtol=2e-2), "mismatch vs reference"

    print("KERNEL_OK")
</pallas_src>

<mosaic_0001>
module attributes {stable_mosaic.version = 11 : i64} {
  func.func @_clf_head_kernel(%arg0: i32, %arg1: memref<2x128xbf16, #tpu.memory_space<vmem>>, %arg2: memref<128x128xbf16, #tpu.memory_space<vmem>>, %arg3: memref<1x128xf32, #tpu.memory_space<vmem>>, %arg4: memref<128x128xbf16, #tpu.memory_space<vmem>>, %arg5: memref<1x128xf32, #tpu.memory_space<vmem>>, %arg6: memref<2x128xf32, #tpu.memory_space<vmem>>) attributes {dimension_semantics = [#tpu.dimension_semantics<parallel>], iteration_bounds = array<i64: 1>, scalar_prefetch = 0 : i64, scratch_operands = 0 : i64, tpu.core_type = #tpu.core_type<tc>, window_params = [{transform_indices = @transform_0, window_bounds = array<i64: 2, 128>}, {pipeline_mode = #tpu.pipeline_mode<synchronous>, transform_indices = @transform_1, window_bounds = array<i64: 128, 128>}, {pipeline_mode = #tpu.pipeline_mode<synchronous>, transform_indices = @transform_2, window_bounds = array<i64: 1, 128>}, {pipeline_mode = #tpu.pipeline_mode<synchronous>, transform_indices = @transform_3, window_bounds = array<i64: 128, 128>}, {pipeline_mode = #tpu.pipeline_mode<synchronous>, transform_indices = @transform_4, window_bounds = array<i64: 1, 128>}, {transform_indices = @transform_5, window_bounds = array<i64: 2, 128>}]} {
    %c0 = arith.constant 0 : index
    %c0_0 = arith.constant 0 : index
    %0 = vector.load %arg1[%c0, %c0_0] : memref<2x128xbf16, #tpu.memory_space<vmem>>, vector<2x128xbf16>
    %c0_1 = arith.constant 0 : index
    %c0_2 = arith.constant 0 : index
    %1 = vector.load %arg2[%c0_1, %c0_2] : memref<128x128xbf16, #tpu.memory_space<vmem>>, vector<128x128xbf16>
    %cst = arith.constant dense<0.000000e+00> : vector<2x128xf32>
    %2 = tpu.matmul %0, %1, %cst {dimension_numbers = #tpu.dot_dimension_numbers<[1], [0], [0], [1], [0, 0, 1, 1], [], []>} : vector<2x128xbf16>, vector<128x128xbf16>, vector<2x128xf32> -> vector<2x128xf32>
    %c0_3 = arith.constant 0 : index
    %c0_4 = arith.constant 0 : index
    %3 = vector.load %arg3[%c0_3, %c0_4] : memref<1x128xf32, #tpu.memory_space<vmem>>, vector<1x128xf32>
    %4 = vector.broadcast %3 : vector<1x128xf32> to vector<2x128xf32>
    %5 = arith.addf %2, %4 : vector<2x128xf32>
    %6 = math.tanh %5 : vector<2x128xf32>
    %7 = arith.truncf %6 : vector<2x128xf32> to vector<2x128xbf16>
    %c0_5 = arith.constant 0 : index
    %c0_6 = arith.constant 0 : index
    %8 = vector.load %arg4[%c0_5, %c0_6] : memref<128x128xbf16, #tpu.memory_space<vmem>>, vector<128x128xbf16>
    %cst_7 = arith.constant dense<0.000000e+00> : vector<2x128xf32>
    %9 = tpu.matmul %7, %8, %cst_7 {dimension_numbers = #tpu.dot_dimension_numbers<[1], [0], [0], [1], [0, 0, 1, 1], [], []>} : vector<2x128xbf16>, vector<128x128xbf16>, vector<2x128xf32> -> vector<2x128xf32>
    %c0_8 = arith.constant 0 : index
    %c0_9 = arith.constant 0 : index
    %10 = vector.load %arg5[%c0_8, %c0_9] : memref<1x128xf32, #tpu.memory_space<vmem>>, vector<1x128xf32>
    %11 = vector.broadcast %10 : vector<1x128xf32> to vector<2x128xf32>
    %12 = arith.addf %9, %11 : vector<2x128xf32>
    %c0_10 = arith.constant 0 : index
    %c0_11 = arith.constant 0 : index
    %13 = vector.load %arg6[%c0_10, %c0_11] : memref<2x128xf32, #tpu.memory_space<vmem>>, vector<2x128xf32>
    tpu.vector_store %arg6[%c0_10, %c0_11], %12 {strides = array<i32>} : memref<2x128xf32, #tpu.memory_space<vmem>>, vector<2x128xf32>,
    return
  }
  func.func @transform_0(%arg0: i32) -> (i32, i32) {
    %c0_i32 = arith.constant 0 : i32
    %c0_i32_0 = arith.constant 0 : i32
    return %arg0, %c0_i32 : i32, i32
  }
  func.func @transform_1(%arg0: i32) -> (i32, i32) {
    %c0_i32 = arith.constant 0 : i32
    %c0_i32_0 = arith.constant 0 : i32
    %c0_i32_1 = arith.constant 0 : i32
    return %c0_i32, %c0_i32_0 : i32, i32
  }
  func.func @transform_2(%arg0: i32) -> (i32, i32) {
    %c0_i32 = arith.constant 0 : i32
    %c0_i32_0 = arith.constant 0 : i32
    %c0_i32_1 = arith.constant 0 : i32
    return %c0_i32, %c0_i32_0 : i32, i32
  }
  func.func @transform_3(%arg0: i32) -> (i32, i32) {
    %c0_i32 = arith.constant 0 : i32
    %c0_i32_0 = arith.constant 0 : i32
    %c0_i32_1 = arith.constant 0 : i32
    return %c0_i32, %c0_i32_0 : i32, i32
  }
  func.func @transform_4(%arg0: i32) -> (i32, i32) {
    %c0_i32 = arith.constant 0 : i32
    %c0_i32_0 = arith.constant 0 : i32
    %c0_i32_1 = arith.constant 0 : i32
    return %c0_i32, %c0_i32_0 : i32, i32
  }
  func.func @transform_5(%arg0: i32) -> (i32, i32) {
    %c0_i32 = arith.constant 0 : i32
    %c0_i32_0 = arith.constant 0 : i32
    return %arg0, %c0_i32 : i32, i32
  }
}

</mosaic_0001>

<bundles_post_ra>
// kernel: wav2vec2_classification_head.1
= control target key start
LH: loop header
LB: loop body
LE: loop exit
PB: predicated region body
PF: predicated region fallthrough
CT: control target
= control target key end

     0   :  { %v383_v1 = vmov 0.0   ;;  %vm384_vm0 = vmmov 0   ;;  %s485_s0 = inlined_call_operand.vmem [shape: bf16[2,128], index: 0, kind: input, shape index: {}]   ;;  %s486_s1 = inlined_call_operand.vmem [shape: bf16[128,128], index: 1, kind: input, shape index: {}]   ;;  %s487_s2 = inlined_call_operand.vmem [shape: f32[1,128], index: 2, kind: input, shape index: {}]   ;;  %s488_s3 = inlined_call_operand.vmem [shape: bf16[128,128], index: 3, kind: input, shape index: {}]   ;;  %s489_s4 = inlined_call_operand.vmem [shape: f32[1,128], index: 4, kind: input, shape index: {}]   ;;  %s490_s5 = inlined_call_operand.hbm [shape: f32[2,128], index: 5, kind: output, shape index: {}]  }
   0x1   :  { %v341_v0 = vld [vmem:[%s486_s1] sm:$0xff]   ;;  %298 = vmatprep.subr.bf16.mxu0 %v383_v1  ;;  %318 = vmatprep.subr.bf16.mxu1 %v383_v1  ;;  %v342_v2 = vld [vmem:[%s486_s1 + $0x8] sm:$0xff]   ;;  %v343_v3 = vld [vmem:[%s486_s1 + $0x10] sm:$0xff]  }
   0x2   :  { %299 = vmatpush3.bf16.msra.mxu0 %v341_v0  ;;  %314 = vmatprep.mubr.msk.bf16.mxu0 %vm384_vm0, %v383_v1  ;;  %v349_v4 = vld [vmem:[%s488_s3] sm:$0xff]   ;;  %v344_v5 = vld [vmem:[%s486_s1 + $0x18] sm:$0xff]   ;;  %v350_v6 = vld [vmem:[%s488_s3 + $0x8] sm:$0xff]  }
   0x3   :  { %300 = vmatprep.subr.bf16.mxu0 %v383_v1  ;;  %334 = vmatprep.mubr.msk.bf16.mxu1 %vm384_vm0, %v383_v1  ;;  %v345_v7 = vld [vmem:[%s486_s1 + $0x20] sm:$0xff]   ;;  %v351_v8 = vld [vmem:[%s488_s3 + $0x10] sm:$0xff]  }
   0x4   :  { %319 = vmatpush3.bf16.msra.mxu1 %v349_v4 }
   0x5   :  { %320 = vmatprep.subr.bf16.mxu1 %v383_v1 }
   0x6   :  { %301 = vmatpush3.bf16.msra.mxu0 %v342_v2 }
   0x7   :  { %302 = vmatprep.subr.bf16.mxu0 %v383_v1 }
   0x8   :  { %321 = vmatpush3.bf16.msra.mxu1 %v350_v6 }
   0xa   :  { %303 = vmatpush3.bf16.msra.mxu0 %v343_v3 }
   0xb   :  { %304 = vmatprep.subr.bf16.mxu0 %v383_v1 }
   0xe   :  { %305 = vmatpush3.bf16.msra.mxu0 %v344_v5 }
   0xf   :  { %306 = vmatprep.subr.bf16.mxu0 %v383_v1 }
  0x10   :  { %10 = vsyncpa [#allocation3], 0  ;;  %322 = vmatprep.subr.bf16.mxu1 %v383_v1  ;;  %v346_v9 = vld [vmem:[%s486_s1 + $0x28] sm:$0xff]   ;;  %v352_v10 = vld [vmem:[%s488_s3 + $0x18] sm:$0xff]   ;;  %s385_s29 = smov [#allocation2]  }
  0x11   :  { %323 = vmatpush3.bf16.msra.mxu1 %v351_v8  ;;  %v347_v11 = vld [vmem:[%s486_s1 + $0x30] sm:$0xff]   ;;  %v348_v12 = vld [vmem:[%s486_s1 + $0x38] sm:$0xff]   ;;  %v22_v13 = vld [vmem:[%s485_s0] sm:$0x1] }
  0x12   :  { %307 = vmatpush3.bf16.msra.mxu0 %v345_v7  ;;  %324 = vmatprep.subr.bf16.mxu1 %v383_v1  ;;  %v353_v14 = vld [vmem:[%s488_s3 + $0x20] sm:$0xff]   ;;  %v354_v15 = vld [vmem:[%s488_s3 + $0x28] sm:$0xff]   ;;  %v355_v16 = vld [vmem:[%s488_s3 + $0x30] sm:$0xff]  }
  0x13   :  { %308 = vmatprep.subr.bf16.mxu0 %v383_v1  ;;  %v356_v17 = vld [vmem:[%s488_s3 + $0x38] sm:$0xff]   ;;  %v262_v18 = vld [vmem:[%s487_s2] ss:$0 sm:$0xff]  ;;  %s254_s3 = sshll.u32 %s385_s29, 4  ;;  %s255_s3 = int_to_ptr.vmem [resolvable:$true] %s254_s3 }
  0x14   :  { %v271_v26 = vld [vmem:[%s489_s4] ss:$0 sm:$0xff]  ;;  %s359_s2 = scalar_lea.vmem %s255_s3, 32  ;;  %p364_p1 = scmp.lt.s32.totalorder %s255_s3, %s255_s3 }
  0x15   :  { %325 = vmatpush3.bf16.msra.mxu1 %v352_v10  ;;  %p360_p0 = scmp.ne.s32.totalorder %s255_s3, %s359_s2  ;;  %p365_p2 = scmp.lt.s32.totalorder %s359_s2, %s359_s2 }
  0x16   :  { %309 = vmatpush3.bf16.msra.mxu0 %v346_v9  ;;  %326 = vmatprep.subr.bf16.mxu1 %v383_v1 }
  0x17   :  { %310 = vmatprep.subr.bf16.mxu0 %v383_v1  ;;  %p366_p3 = por %p365_p2, %p364_p1 }
  0x19   :  { %327 = vmatpush3.bf16.msra.mxu1 %v353_v14  ;;  %p367_p4 = pnand %p366_p3, %p360_p0 }
  0x1a   :  { %311 = vmatpush3.bf16.msra.mxu0 %v347_v11  ;;  %328 = vmatprep.subr.bf16.mxu1 %v383_v1 }
  0x1b   :  { %312 = vmatprep.subr.bf16.mxu0 %v383_v1 }
  0x1d   :  { %329 = vmatpush3.bf16.msra.mxu1 %v354_v15 }
  0x1e   :  { %313 = vmatpush3.bf16.msra.mxu0 %v348_v12  ;;  %330 = vmatprep.subr.bf16.mxu1 %v383_v1 }
  0x21   :  { %315 = vmatmul.mubr.bf16.vlgmr.msra.gmra.mrb[0].mxu0 %v22_v13  ;;  %331 = vmatpush3.bf16.msra.mxu1 %v355_v16 }
  0x22   :  { %332 = vmatprep.subr.bf16.mxu1 %v383_v1 }
  0x25   :  { %333 = vmatpush3.bf16.msra.mxu1 %v356_v17 }
  0xf4   :  { %v128_v19 = vpop.f32.mrb[0].mxu0 }
  0xf5   :  { %v129_v20 = vadd.f32 %v262_v18, %v128_v19  ;;  %v316_v21 = vpop.f32.mrb[1].mxu0 }
  0xf6   :  { %v131_v22 = vpop.f32.mrb[2].mxu0 }
  0xf7   :  { %357 = vtanh.f32 %v129_v20  ;;  %v317_v23 = vpop.f32.mrb[3].mxu0 }
 0x101   :  { %v358_v24 = vpop.eup %357 }
 0x102   :  { %v135_v25 = vpack.c.bf16 %v358_v24, %v358_v24 }
 0x104   :  { %335 = vmatmul.mubr.bf16.vlgmr.msra.gmra.mrb[0].mxu1 %v135_v25 }
 0x1d7   :  { %v241_v27 = vpop.f32.mrb[0].mxu1 }
 0x1d8   :  { %v242_v28 = vadd.f32 %v271_v26, %v241_v27  ;;  %v336_v29 = vpop.f32.mrb[1].mxu1 }
 0x1d9   :  { %v244_v30 = vpop.f32.mrb[2].mxu1 }
 0x1da   :  { %247 = vst [vmem:[#allocation2] sm:$0x3] %v242_v28  ;;  %v337_v31 = vpop.f32.mrb[3].mxu1 }
 0x1db   :  { %370 = shalt.err (!%p367_p4)
}
 0x1dc   :  { %s371_s4 = scalar_lea.hbm %s490_s5, 32 }
 0x1dd   :  { %p372_p5 = scmp.ne.s32.totalorder %s490_s5, %s371_s4  ;;  %p375_p6 = scmp.lt.u32.totalorder %s371_s4, %s490_s5 }
 0x1df   :  { %p377_p7 = pnand %p375_p6, %p372_p5 }
 0x1e1   :  { %380 = shalt.err (!%p377_p7)
}
 0x1e2   :  { %257 = dma.vmem_to_hbm [thread:$0]  %s255_s3, 32, %s490_s5, [#allocation3]  }
 0x1e3   :  { %381 = dma.done.wait [#allocation3], 32  }
 0x1e4   :  { %382 = vsyncadd [#allocation3], 4294967264 }
 0x1e5   :  { %261 = vsyncpa [#allocation3], 1 }

</bundles_post_ra>
